<compile_context>
chip_gen: v7x
topology: tpu7x:2x2x1
jax: 0.10.0
libtpu: 0.0.40
codegen_flags: <defaults>
</compile_context>

<pallas_src>
import jax
import jax.numpy as jnp
from jax.experimental import pallas as pl
from jax.experimental.pallas import tpu as pltpu


def _round_up(x, m):
    return (x + m - 1) // m * m


def mlp_kernel(x_ref, w1_ref, b1_ref, w2_ref, b2_ref, w3_ref, b3_ref, o_ref):
    # Layer 1: bf16 x @ bf16 W1 on the MXU, f32 accumulation; bias + ReLU on VPU.
    h = jnp.dot(x_ref[...], w1_ref[...], preferred_element_type=jnp.float32)
    h = jnp.maximum(h + b1_ref[...], 0.0)
    # Layer 2: h @ W2 + b2, ReLU.
    h = jnp.dot(h.astype(w2_ref.dtype), w2_ref[...],
                preferred_element_type=jnp.float32)
    h = jnp.maximum(h + b2_ref[...], 0.0)
    # Layer 3: h @ W3 + b3 (no activation).
    out = jnp.dot(h.astype(w3_ref.dtype), w3_ref[...],
                  preferred_element_type=jnp.float32)
    o_ref[...] = (out + b3_ref[...]).astype(o_ref.dtype)


def prepare_params(params, *, weight_dtype=jnp.bfloat16):
    """One-time weight prep, hoisted out of the per-forward path.

    * Output feature dims are lane-padded to multiples of 128 (10 -> 128 for
      fc3); the fc1 contraction dim stays at its natural 784 (no K pad).
    * Weights cast to bf16 for MXU rate / HBM bytes; biases kept f32 and added
      after the f32 accumulation, so zero-padded columns stay exact.
    """
    w1, b1, w2, b2, w3, b3 = params
    d_in, h1 = w1.shape
    _, h2 = w2.shape
    _, d_out = w3.shape
    h1_p = _round_up(h1, 128)       # 256 (already aligned)
    h2_p = _round_up(h2, 128)       # 128 (already aligned)
    d_out_p = _round_up(d_out, 128)  # 10 -> 128

    w1_p = jnp.pad(w1, ((0, 0), (0, h1_p - h1))).astype(weight_dtype)
    b1_p = jnp.pad(b1.reshape(1, h1), ((0, 0), (0, h1_p - h1))).astype(jnp.float32)
    w2_p = jnp.pad(w2, ((0, h1_p - h1), (0, h2_p - h2))).astype(weight_dtype)
    b2_p = jnp.pad(b2.reshape(1, h2), ((0, 0), (0, h2_p - h2))).astype(jnp.float32)
    w3_p = jnp.pad(w3, ((0, h2_p - h2), (0, d_out_p - d_out))).astype(weight_dtype)
    b3_p = jnp.pad(b3.reshape(1, d_out), ((0, 0), (0, d_out_p - d_out))).astype(jnp.float32)
    return (w1_p, b1_p, w2_p, b2_p, w3_p, b3_p)


def mlp_forward(x, prepped, *, d_out=10, tile_b=512):
    """Equivalent of MLP.forward: x.view(B, -1) -> fc1 -> ReLU -> fc2 -> ReLU -> fc3."""
    w1_p, b1_p, w2_p, b2_p, w3_p, b3_p = prepped
    d_in, h1_p = w1_p.shape
    h2_p = w2_p.shape[1]
    d_out_p = w3_p.shape[1]

    B = x.shape[0]
    x2d = x.reshape(B, -1).astype(jnp.bfloat16)   # bf16 activations: MXU + HBM win
    assert x2d.shape[1] == d_in

    # Batch tiling: 16-aligned tiles (bf16 sublane packing), re-balanced to keep
    # zero-row padding small, and >=2 grid steps when B allows so the parallel
    # batch axis can shard across v7x's two TensorCores.
    B16 = _round_up(B, 16)
    tb = max(16, min(_round_up(tile_b, 16), B16))
    if B16 >= 32 and B16 // tb < 2:
        tb = _round_up(pl.cdiv(B16, 2), 16)
    n_tiles = pl.cdiv(B16, tb)
    tb = _round_up(pl.cdiv(B16, n_tiles), 16)
    B_p = n_tiles * tb

    x_p = jnp.pad(x2d, ((0, B_p - B), (0, 0))) if B_p != B else x2d

    flops = 2 * B_p * (d_in * h1_p + h1_p * h2_p + h2_p * d_out_p)
    bytes_accessed = (
        x_p.size * x_p.dtype.itemsize
        + sum(a.size * a.dtype.itemsize for a in prepped)
        + B_p * d_out_p * 4  # f32 output writeback
    )

    out_pad = pl.pallas_call(
        mlp_kernel,
        out_shape=jax.ShapeDtypeStruct((B_p, d_out_p), jnp.float32),
        grid=(n_tiles,),
        in_specs=[
            # x: tiled over batch; last dim = full 784 (no K pad needed).
            pl.BlockSpec((tb, d_in), lambda i: (i, 0)),
            # Weights / biases: constant index_map -> VMEM-resident across grid.
            pl.BlockSpec((d_in, h1_p), lambda i: (0, 0)),
            pl.BlockSpec((1, h1_p), lambda i: (0, 0)),
            pl.BlockSpec((h1_p, h2_p), lambda i: (0, 0)),
            pl.BlockSpec((1, h2_p), lambda i: (0, 0)),
            pl.BlockSpec((h2_p, d_out_p), lambda i: (0, 0)),
            pl.BlockSpec((1, d_out_p), lambda i: (0, 0)),
        ],
        out_specs=pl.BlockSpec((tb, d_out_p), lambda i: (i, 0)),
        compiler_params=pltpu.CompilerParams(
            dimension_semantics=("parallel",),
            vmem_limit_bytes=32 << 20,
        ),
        cost_estimate=pl.CostEstimate(
            flops=flops, transcendentals=0, bytes_accessed=bytes_accessed),
    )(x_p, w1_p, b1_p, w2_p, b2_p, w3_p, b3_p)

    # Strip batch / lane padding.
    return out_pad[:B, :d_out]


def init_params(key, d_in=784, h1=256, h2=128, d_out=10, dtype=jnp.float32):
    """Deterministic init mimicking nn.Linear's U(-1/sqrt(fan_in), +1/sqrt(fan_in)).

    Weights stored as [d_in, d_out] (transposed from PyTorch's [out, in]) so the
    kernel computes x @ W + b directly on the MXU; biases as [1, d_out] rows.
    """
    def linear(k, fan_in, fan_out):
        kw, kb = jax.random.split(k)
        bound = 1.0 / jnp.sqrt(jnp.asarray(fan_in, dtype))
        w = jax.random.uniform(kw, (fan_in, fan_out), dtype, -bound, bound)
        b = jax.random.uniform(kb, (1, fan_out), dtype, -bound, bound)
        return w, b

    k1, k2, k3 = jax.random.split(key, 3)
    w1, b1 = linear(k1, d_in, h1)
    w2, b2 = linear(k2, h1, h2)
    w3, b3 = linear(k3, h2, d_out)
    return (w1, b1, w2, b2, w3, b3)


def mlp_reference(x, params):
    w1, b1, w2, b2, w3, b3 = params
    x2d = x.reshape(x.shape[0], -1)
    h = jnp.maximum(x2d @ w1 + b1, 0.0)
    h = jnp.maximum(h @ w2 + b2, 0.0)
    return h @ w3 + b3


if __name__ == "__main__":
    key = jax.random.PRNGKey(0)
    kx, kp = jax.random.split(key)

    # Small batch of "images" [B, 1, 28, 28] -> view(B, 784), matching the module defaults.
    B = 32
    x = jax.random.normal(kx, (B, 1, 28, 28), jnp.float32)
    params = init_params(kp)

    # One-time weight prep (hoisted out of the forward path).
    prepped = prepare_params(params)

    # tile_b=16 -> grid=(2,) so the batch-tiled, dual-core-shardable pipeline
    # path is exercised even at this toy batch size (default tile_b=512).
    out = mlp_forward(x, prepped, d_out=10, tile_b=16)
    out = jax.block_until_ready(out)

    ref = mlp_reference(x, params)
    assert out.shape == (B, 10)
    # Tolerance loosened: activations and weights run in bf16 (f32 MXU
    # accumulation) vs. the pure-f32 reference.
    assert jnp.allclose(out, ref, atol=5e-2, rtol=5e-2), float(jnp.max(jnp.abs(out - ref)))

    print("KERNEL_OK")
</pallas_src>

<mosaic_0001>
module attributes {stable_mosaic.version = 11 : i64} {
  func.func @mlp_kernel(%arg0: i32, %arg1: memref<16x784xbf16, #tpu.memory_space<vmem>>, %arg2: memref<784x256xbf16, #tpu.memory_space<vmem>>, %arg3: memref<1x256xf32, #tpu.memory_space<vmem>>, %arg4: memref<256x128xbf16, #tpu.memory_space<vmem>>, %arg5: memref<1x128xf32, #tpu.memory_space<vmem>>, %arg6: memref<128x128xbf16, #tpu.memory_space<vmem>>, %arg7: memref<1x128xf32, #tpu.memory_space<vmem>>, %arg8: memref<16x128xf32, #tpu.memory_space<vmem>>) attributes {dimension_semantics = [#tpu.dimension_semantics<parallel>], iteration_bounds = array<i64: 2>, scalar_prefetch = 0 : i64, scratch_operands = 0 : i64, tpu.core_type = #tpu.core_type<tc>, window_params = [{transform_indices = @transform_0, window_bounds = array<i64: 16, 784>}, {pipeline_mode = #tpu.pipeline_mode<synchronous>, transform_indices = @transform_1, window_bounds = array<i64: 784, 256>}, {pipeline_mode = #tpu.pipeline_mode<synchronous>, transform_indices = @transform_2, window_bounds = array<i64: 1, 256>}, {pipeline_mode = #tpu.pipeline_mode<synchronous>, transform_indices = @transform_3, window_bounds = array<i64: 256, 128>}, {pipeline_mode = #tpu.pipeline_mode<synchronous>, transform_indices = @transform_4, window_bounds = array<i64: 1, 128>}, {pipeline_mode = #tpu.pipeline_mode<synchronous>, transform_indices = @transform_5, window_bounds = array<i64: 128, 128>}, {pipeline_mode = #tpu.pipeline_mode<synchronous>, transform_indices = @transform_6, window_bounds = array<i64: 1, 128>}, {transform_indices = @transform_7, window_bounds = array<i64: 16, 128>}]} {
    %c0 = arith.constant 0 : index
    %c0_0 = arith.constant 0 : index
    %0 = vector.load %arg1[%c0, %c0_0] : memref<16x784xbf16, #tpu.memory_space<vmem>>, vector<16x784xbf16>
    %c0_1 = arith.constant 0 : index
    %c0_2 = arith.constant 0 : index
    %1 = vector.load %arg2[%c0_1, %c0_2] : memref<784x256xbf16, #tpu.memory_space<vmem>>, vector<784x256xbf16>
    %cst = arith.constant dense<0.000000e+00> : vector<16x256xf32>
    %2 = tpu.matmul %0, %1, %cst {dimension_numbers = #tpu.dot_dimension_numbers<[1], [0], [0], [1], [0, 0, 1, 1], [], []>} : vector<16x784xbf16>, vector<784x256xbf16>, vector<16x256xf32> -> vector<16x256xf32>
    %c0_3 = arith.constant 0 : index
    %c0_4 = arith.constant 0 : index
    %3 = vector.load %arg3[%c0_3, %c0_4] : memref<1x256xf32, #tpu.memory_space<vmem>>, vector<1x256xf32>
    %4 = vector.broadcast %3 : vector<1x256xf32> to vector<16x256xf32>
    %5 = arith.addf %2, %4 : vector<16x256xf32>
    %cst_5 = arith.constant 0.000000e+00 : f32
    %6 = vector.broadcast %cst_5 : f32 to vector<16x256xf32>
    %7 = arith.maximumf %5, %6 : vector<16x256xf32>
    %8 = arith.truncf %7 : vector<16x256xf32> to vector<16x256xbf16>
    %c0_6 = arith.constant 0 : index
    %c0_7 = arith.constant 0 : index
    %9 = vector.load %arg4[%c0_6, %c0_7] : memref<256x128xbf16, #tpu.memory_space<vmem>>, vector<256x128xbf16>
    %cst_8 = arith.constant dense<0.000000e+00> : vector<16x128xf32>
    %10 = tpu.matmul %8, %9, %cst_8 {dimension_numbers = #tpu.dot_dimension_numbers<[1], [0], [0], [1], [0, 0, 1, 1], [], []>} : vector<16x256xbf16>, vector<256x128xbf16>, vector<16x128xf32> -> vector<16x128xf32>
    %c0_9 = arith.constant 0 : index
    %c0_10 = arith.constant 0 : index
    %11 = vector.load %arg5[%c0_9, %c0_10] : memref<1x128xf32, #tpu.memory_space<vmem>>, vector<1x128xf32>
    %12 = vector.broadcast %11 : vector<1x128xf32> to vector<16x128xf32>
    %13 = arith.addf %10, %12 : vector<16x128xf32>
    %cst_11 = arith.constant 0.000000e+00 : f32
    %14 = vector.broadcast %cst_11 : f32 to vector<16x128xf32>
    %15 = arith.maximumf %13, %14 : vector<16x128xf32>
    %16 = arith.truncf %15 : vector<16x128xf32> to vector<16x128xbf16>
    %c0_12 = arith.constant 0 : index
    %c0_13 = arith.constant 0 : index
    %17 = vector.load %arg6[%c0_12, %c0_13] : memref<128x128xbf16, #tpu.memory_space<vmem>>, vector<128x128xbf16>
    %cst_14 = arith.constant dense<0.000000e+00> : vector<16x128xf32>
    %18 = tpu.matmul %16, %17, %cst_14 {dimension_numbers = #tpu.dot_dimension_numbers<[1], [0], [0], [1], [0, 0, 1, 1], [], []>} : vector<16x128xbf16>, vector<128x128xbf16>, vector<16x128xf32> -> vector<16x128xf32>
    %c0_15 = arith.constant 0 : index
    %c0_16 = arith.constant 0 : index
    %19 = vector.load %arg7[%c0_15, %c0_16] : memref<1x128xf32, #tpu.memory_space<vmem>>, vector<1x128xf32>
    %20 = vector.broadcast %19 : vector<1x128xf32> to vector<16x128xf32>
    %21 = arith.addf %18, %20 : vector<16x128xf32>
    %c0_17 = arith.constant 0 : index
    %c0_18 = arith.constant 0 : index
    %22 = vector.load %arg8[%c0_17, %c0_18] : memref<16x128xf32, #tpu.memory_space<vmem>>, vector<16x128xf32>
    tpu.vector_store %arg8[%c0_17, %c0_18], %21 {strides = array<i32>} : memref<16x128xf32, #tpu.memory_space<vmem>>, vector<16x128xf32>,
    return
  }
  func.func @transform_0(%arg0: i32) -> (i32, i32) {
    %c0_i32 = arith.constant 0 : i32
    %c0_i32_0 = arith.constant 0 : i32
    return %arg0, %c0_i32 : i32, i32
  }
  func.func @transform_1(%arg0: i32) -> (i32, i32) {
    %c0_i32 = arith.constant 0 : i32
    %c0_i32_0 = arith.constant 0 : i32
    %c0_i32_1 = arith.constant 0 : i32
    return %c0_i32, %c0_i32_0 : i32, i32
  }
  func.func @transform_2(%arg0: i32) -> (i32, i32) {
    %c0_i32 = arith.constant 0 : i32
    %c0_i32_0 = arith.constant 0 : i32
    %c0_i32_1 = arith.constant 0 : i32
    return %c0_i32, %c0_i32_0 : i32, i32
  }
  func.func @transform_3(%arg0: i32) -> (i32, i32) {
    %c0_i32 = arith.constant 0 : i32
    %c0_i32_0 = arith.constant 0 : i32
    %c0_i32_1 = arith.constant 0 : i32
    return %c0_i32, %c0_i32_0 : i32, i32
  }
  func.func @transform_4(%arg0: i32) -> (i32, i32) {
    %c0_i32 = arith.constant 0 : i32
    %c0_i32_0 = arith.constant 0 : i32
    %c0_i32_1 = arith.constant 0 : i32
    return %c0_i32, %c0_i32_0 : i32, i32
  }
  func.func @transform_5(%arg0: i32) -> (i32, i32) {
    %c0_i32 = arith.constant 0 : i32
    %c0_i32_0 = arith.constant 0 : i32
    %c0_i32_1 = arith.constant 0 : i32
    return %c0_i32, %c0_i32_0 : i32, i32
  }
  func.func @transform_6(%arg0: i32) -> (i32, i32) {
    %c0_i32 = arith.constant 0 : i32
    %c0_i32_0 = arith.constant 0 : i32
    %c0_i32_1 = arith.constant 0 : i32
    return %c0_i32, %c0_i32_0 : i32, i32
  }
  func.func @transform_7(%arg0: i32) -> (i32, i32) {
    %c0_i32 = arith.constant 0 : i32
    %c0_i32_0 = arith.constant 0 : i32
    return %arg0, %c0_i32 : i32, i32
  }
}

</mosaic_0001>

<bundles_post_ra>
// kernel: tpu_custom_call.1
= control target key start
LH: loop header
LB: loop body
LE: loop exit
PB: predicated region body
PF: predicated region fallthrough
CT: control target
= control target key end

     0   :  { %s2591_s0 = inlined_call_operand.hbm [shape: bf16[32,784], index: 0, kind: input, shape index: {}]   ;;  %s2592_s1 = inlined_call_operand.hbm [shape: bf16[784,256], index: 1, kind: input, shape index: {}]   ;;  %s2593_s2 = inlined_call_operand.vmem [shape: f32[1,256], index: 2, kind: input, shape index: {}]   ;;  %s2594_s3 = inlined_call_operand.hbm [shape: bf16[256,128], index: 3, kind: input, shape index: {}]   ;;  %s2595_s4 = inlined_call_operand.vmem [shape: f32[1,128], index: 4, kind: input, shape index: {}]   ;;  %s2596_s5 = inlined_call_operand.hbm [shape: bf16[128,128], index: 5, kind: input, shape index: {}]   ;;  %s2597_s6 = inlined_call_operand.vmem [shape: f32[1,128], index: 6, kind: input, shape index: {}]   ;;  %s2598_s7 = inlined_call_operand.hbm [shape: f32[32,128], index: 7, kind: output, shape index: {}]  }
   0x1   :  { %2603 = sst [smem:[#allocation16_spill]] %s2592_s1 }
   0x2   :  { %12 = vsyncpa [#allocation3], 0 }
   0x3   :  { %14 = vsyncpa [#allocation3 + $0x1], 0 }
   0x4   :  { %15 = vsyncpa [#allocation6], 0 }
   0x5   :  { %16 = vsyncpa [#allocation9], 0 }
   0x6   :  { %17 = vsyncpa [#allocation4], 0 }
   0x7   :  { %19 = vsyncpa [#allocation4 + $0x1], 0  ;;  %s2316_s24 = smov 0   ;;  %s2318_s25 = smov 0  }
   0x8   :  { %s2320_s26 = smov 0   ;;  %s2322_s27 = smov 0  }
   0x9 LB: > { %s2337_s28 = sadd.s32 4294967295, %s2258_s27   ;;  %s1579_s29 = sadd.s32 4294967294, %s2258_s27   ;;  %s2258_s27 = sphi %s2322_s27, %s2626_s27   ;;  %s2254_s26 = sphi %s2320_s26, %s2625_s26   ;;  %s2250_s25 = sphi %s2318_s25, %s2624_s25   ;;  %s2246_s24 = sphi %s2316_s24, %s2623_s24  }
   0xa   : > { %p45_p0 = scmp.ne.s32.totalorder %s2250_s25, %s2246_s24  ;;  %p2599_p1 = scmp.eq.s32.totalorder %s2337_s28, 0 }
   0xb   : > { %p201_p3 = scmp.eq.s32.totalorder %s1579_s29, 1  ;;  %p1580_p5 = scmp.ge.s32.totalorder %s2258_s27, 1 }
   0xc   : > { %p2346_p4 = por %p2599_p1, %p45_p0  ;;  %p208_p7 = scmp.lt.s32.totalorder %s2258_s27, 3 }
   0xd   : > { %p2351_p6 = por %p201_p3, %p45_p0  ;;  %s2260_s10 = smov [#allocation5]  }
   0xe   : > { %s2604_s30 = scalar_select %p2346_p4, 1, 0 }
   0xf   : > { %s2605_s8 = scalar_select %p2351_p6, 1, 0 }
  0x10   : > { %p2356_p8 = pnand %p1580_p5, %p208_p7  ;;  %s220_s11 = sshll.u32 %s2260_s10, 4  ;;  %s2360_s11 = int_to_ptr.vmem [resolvable:$true] %s220_s11 }
  0x11   : > { %2606 = sst [smem:[#allocation15_spill]] %s2605_s8  ;;  %s2261_s13 = smov [#allocation7]  }
  0x12   : > { %s2607_s9 = scalar_select %p2356_p8, 1, 0 }
  0x13   : > { %p1817_p9 = pneg %p2356_p8  ;;  %s236_s14 = sshll.u32 %s2261_s13, 4  ;;  %s2371_s14 = int_to_ptr.vmem [resolvable:$true] %s236_s14 }
  0x14   : > { %s2609_s1 = sld [smem:[#allocation16_spill]] }
  0x15   : > { %p2367_p11 = pnand %p1817_p9, %p2599_p1 }
  0x17   : > { %p2381_p13 = pneg %p2367_p11 }
  0x1a   : > { %s2070_s17 = scalar_lea.hbm %s2609_s1, 12544 }
  0x1b   : > { %p2071_p12 = scmp.ne.s32.totalorder %s2609_s1, %s2070_s17  ;;  %p2077_p5 = scmp.lt.u32.totalorder %s2070_s17, %s2609_s1 }
  0x1d   : > { %p2073_p0 = pnand %p2381_p13, %p2071_p12 }
  0x1f   : > { %p2074_p3 = pneg %p2073_p0 }
  0x21   : > { %p2079_p7 = pnand %p2077_p5, %p2074_p3 }
  0x23   : > { %2082 = shalt.err (!%p2079_p7)
}
  0x24   : > { %s2083_s23 = scalar_lea.vmem %s2360_s11, 12544  ;;  %p2091_p2 = scmp.lt.s32.totalorder %s2360_s11, %s2360_s11 }
  0x25   : > { %p2084_p9 = scmp.ne.s32.totalorder %s2360_s11, %s2083_s23  ;;  %p2092_p6 = scmp.lt.s32.totalorder %s2083_s23, %s2083_s23 }
  0x27   : > { %p2086_p10 = pnand %p2084_p9, %p2381_p13  ;;  %p2093_p12 = por %p2092_p6, %p2091_p2 }
  0x29   : > { %p2087_p1 = pneg %p2086_p10 }
  0x2b   : > { %p2094_p0 = pnand %p2093_p12, %p2087_p1 }
  0x2d   : > { %2097 = shalt.err (!%p2094_p0)
}
  0x2e   : > { %s2262_s29 = smov 128   ;;  %s2263_s10 = smov 8  }
  0x2f   : > { %1820 = dma.hbm_to_vmem [thread:$0]  (!%p2367_p11), %s2609_s1, 12544, %s2360_s11, [#allocation6], %s2262_s29, %s2262_s29, %s2263_s10  }
  0x30   : > { %s2098_s18 = scalar_lea.hbm %s2594_s3, 2048 }
  0x31   : > { %p2099_p2 = scmp.ne.s32.totalorder %s2594_s3, %s2098_s18  ;;  %p2105_p10 = scmp.lt.u32.totalorder %s2098_s18, %s2594_s3 }
  0x33   : > { %p2101_p1 = pnand %p2099_p2, %p2381_p13 }
  0x35   : > { %p2102_p6 = pneg %p2101_p1 }
  0x37   : > { %p2107_p3 = pnand %p2105_p10, %p2102_p6 }
  0x39   : > { %2110 = shalt.err (!%p2107_p3)
}
  0x3a   : > { %s2111_s11 = scalar_lea.vmem %s2371_s14, 2048  ;;  %p2119_p12 = scmp.lt.s32.totalorder %s2371_s14, %s2371_s14 }
  0x3b   : > { %p2112_p5 = scmp.ne.s32.totalorder %s2371_s14, %s2111_s11  ;;  %p2120_p0 = scmp.lt.s32.totalorder %s2111_s11, %s2111_s11 }
  0x3d   : > { %p2114_p7 = pnand %p2112_p5, %p2381_p13  ;;  %p2121_p2 = por %p2120_p0, %p2119_p12 }
  0x3f   : > { %p2115_p9 = pneg %p2114_p7 }
  0x41   : > { %p2122_p1 = pnand %p2121_p2, %p2115_p9 }
  0x43   : > { %2125 = shalt.err (!%p2122_p1)
}
  0x44   : > { %s2264_s29 = smov 64   ;;  %s2265_s10 = smov 4  }
  0x45   : > { %1823 = dma.hbm_to_vmem [thread:$0]  (!%p2367_p11), %s2594_s3, 2048, %s2371_s14, [#allocation6], %s2264_s29, %s2264_s29, %s2265_s10  }
  0x46   : > { %s2266_s16 = smov [#allocation8]   ;;  %s2426_s18 = sadd.s32 1, %s2258_s27  }
  0x47   : > { %s252_s17 = sshll.u32 %s2266_s16, 4  ;;  %s2126_s22 = scalar_lea.hbm %s2596_s5, 1024  ;;  %s253_s17 = int_to_ptr.vmem [resolvable:$true] %s252_s17 }
  0x48   : > { %p2127_p6 = scmp.ne.s32.totalorder %s2596_s5, %s2126_s22  ;;  %p2133_p5 = scmp.lt.u32.totalorder %s2126_s22, %s2596_s5 }
  0x4a   : > { %p2129_p10 = pnand %p2127_p6, %p2381_p13 }
  0x4c   : > { %p2130_p3 = pneg %p2129_p10 }
  0x4e   : > { %p2135_p7 = pnand %p2133_p5, %p2130_p3 }
  0x50   : > { %2138 = shalt.err (!%p2135_p7)
}
  0x51   : > { %s2139_s14 = scalar_lea.vmem %s253_s17, 1024  ;;  %p2147_p2 = scmp.lt.s32.totalorder %s253_s17, %s253_s17 }
  0x52   : > { %p2140_p9 = scmp.ne.s32.totalorder %s253_s17, %s2139_s14  ;;  %p2148_p1 = scmp.lt.s32.totalorder %s2139_s14, %s2139_s14 }
  0x54   : > { %p2142_p12 = pnand %p2140_p9, %p2381_p13  ;;  %p2149_p4 = por %p2148_p1, %p2147_p2 }
  0x56   : > { %p2143_p0 = pneg %p2142_p12 }
  0x58   : > { %p2150_p8 = pnand %p2149_p4, %p2143_p0 }
  0x5a   : > { %2153 = shalt.err (!%p2150_p8)
}
  0x5b   : > { %1826 = dma.hbm_to_vmem [thread:$0]  (!%p2367_p11), %s2596_s5, 1024, %s253_s17, [#allocation9], %s2264_s29, %s2264_s29, %s2265_s10  }
  0x5c   : > { %s29_s1 = ssub.s32 %s2258_s27, %s2426_s18  ;;  %s32_s8 = sadd.s32 1, %s2254_s26 }
  0x5d   : > { %p30_p4 = scmp.eq.s32.totalorder %s29_s1, 0  ;;  %p39_p8 = scmp.ne.s32.totalorder %s2254_s26, %s2250_s25 }
  0x5e   : > { %p40_p13 = scmp.eq.s32.totalorder %s2258_s27, 0  ;;  %p1838_p6 = scmp.lt.s32.totalorder %s2258_s27, 2 }
  0x5f   : > { %s2454_s12 = scalar_select %p30_p4, %s2254_s26, %s32_s8  }
  0x60   : > { %p41_p10 = por %p40_p13, %p39_p8  ;;  %p2611_p3 = scmp.eq.s32.totalorder %s2337_s28, 1 }
  0x61   : > { %s269_s16 = sand.u32 1, %s2254_s26   ;;  %s1799_s19 = smul.u32 896, %s2258_s27 }
  0x62   : > { %p2458_p5 = por %p2611_p3, %p39_p8  ;;  %s1798_s21 = smul.u32 56, %s269_s16 }
  0x63   : > { %s2467_s29 = scalar_lea.hbm %s2591_s0, %s1799_s19  ;;  %p2469_p11 = pnand %p1838_p6, %p41_p10 }
  0x64   : > { %s273_s17 = scalar_lea.vmem [#allocation2], %s1798_s21  ;;  %s2475_s14 = scalar_lea.sflag [#allocation3], %s269_s16 }
  0x65   : > { %s281_s11 = sshll.u32 %s273_s17, 4  ;;  %s2154_s13 = scalar_lea.hbm %s2467_s29, 896  ;;  %s2473_s11 = int_to_ptr.vmem [resolvable:$true] %s281_s11 }
  0x66   : > { %p2155_p7 = scmp.ne.s32.totalorder %s2467_s29, %s2154_s13  ;;  %p2156_p9 = pneg %p2469_p11 }
  0x67   : > { %s2159_s8 = scalar_lea.hbm %s2591_s0, 1792  ;;  %p2160_p2 = scmp.lt.u32.totalorder %s2467_s29, %s2591_s0 }
  0x68   : > { %p2157_p12 = pnand %p2156_p9, %p2155_p7  ;;  %p2161_p1 = scmp.lt.u32.totalorder %s2159_s8, %s2154_s13 }
  0x69   : > { %p2163_p8 = scmp.lt.u32.totalorder %s2154_s13, %s2467_s29 }
  0x6a   : > { %p2158_p0 = pneg %p2157_p12  ;;  %p2162_p4 = por %p2161_p1, %p2160_p2 }
  0x6c   : > { %p2164_p13 = por %p2163_p8, %p2162_p4 }
  0x6e   : > { %p2165_p6 = pnand %p2164_p13, %p2158_p0 }
  0x70   : > { %2168 = shalt.err (!%p2165_p6)
}
  0x71   : > { %s2169_s16 = scalar_lea.vmem %s2473_s11, 896  ;;  %s2267_s21 = smov [#allocation2]  }
  0x72   : > { %p2170_p10 = scmp.ne.s32.totalorder %s2473_s11, %s2169_s16  ;;  %s2174_s23 = sshll.u32 %s2267_s21, 4  ;;  %s2175_s23 = int_to_ptr.vmem [resolvable:$false] %s2174_s23 }
  0x73   : > { %s2176_s17 = scalar_lea.vmem %s2175_s23, 1792  ;;  %p2177_p12 = scmp.lt.s32.totalorder %s2473_s11, %s2175_s23 }
  0x74   : > { %p2172_p3 = pnand %p2170_p10, %p2156_p9  ;;  %p2178_p2 = scmp.lt.s32.totalorder %s2176_s17, %s2169_s16 }
  0x76   : > { %p2173_p7 = pneg %p2172_p3  ;;  %p2179_p1 = por %p2178_p2, %p2177_p12 }
  0x78   : > { %p2180_p4 = pnand %p2179_p1, %p2173_p7 }
  0x7a   : > { %2183 = shalt.err (!%p2180_p4)
}
  0x7b   : > { %s2268_s13 = smov 448   ;;  %s2269_s15 = smov 28  }
  0x7c   : > { %1830 = dma.hbm_to_vmem [thread:$0]  (!%p2469_p11), %s2467_s29, 896, %s2473_s11, %s2475_s14, %s2268_s13, %s2268_s13, %s2269_s15  }
  0x7d   : > { %p2614_p9 = scmp.ne.s32.totalorder %s2607_s9, 0 }
  0x7e   : > { %s2506_s1 = sand.u32 (!%p2614_p9), 1, %s2250_s25   ;;  %p2615_p0 = scmp.ne.s32.totalorder (!%p2614_p9), %s2604_s30, 0 }
  0x7f   : > { %293 = sbr.rel (%p2614_p9) target bundleno = 959 (0x3bf), region = 48  ;;  %s296_s19 = scalar_lea.sflag (!%p2614_p9), [#allocation3], %s2506_s1 }
  0x80   : > { %s1800_s8 = smul.u32 (!%p2614_p9), 56, %s2506_s1 }
  0x82   : > { %s2510_s22 = scalar_lea.vmem (!%p2614_p9), [#allocation2], %s1800_s8 }
  0x86   : > { %2229 = dma.done.wait (%p2615_p0), %s296_s19, 896  }
  0x87   : > { %2231 = vsyncadd (%p2615_p0), %s296_s19, 4294966400  ;;  %p2616_p11 = scmp.eq.s32.totalorder %s2337_s28, 0 }
  0x89   : > { %2233 = dma.done.wait (%p2616_p11), [#allocation6], 14592   ;;  %p2617_p8 = pmov %p2616_p11 }
  0x8b   : > { %2235 = vsyncadd (%p2617_p8), [#allocation6], 4294952704  ;;  %p2618_p13 = pmov %p2617_p8 }
  0x8c   : > { %p2619_p6 = pmov %p2617_p8 }
  0x8d   : > { %2237 = dma.done.wait (%p2618_p13), [#allocation9], 1024  }
  0x8e   : > { %2239 = vsyncadd (%p2619_p6), [#allocation9], 4294966272  ;;  %v1889_v0 = vld [vmem:[#allocation5 + $0x104] ss:$8 sps:$4 sm:$0xff]   ;;  %v1891_v1 = vld [vmem:[#allocation5 + $0x100] ss:$8 sps:$4 sm:$0xff]  }
  0x8f   : > { %1035 = vmatprep.subr.bf16.mxu0 %v1889_v0  ;;  %v1892_v2 = vld [vmem:[#allocation5 + $0x114] ss:$8 sps:$4 sm:$0xff]   ;;  %v1894_v3 = vld [vmem:[#allocation5 + $0x110] ss:$8 sps:$4 sm:$0xff]   ;;  %v1895_v4 = vld [vmem:[#allocation5 + $0x124] ss:$8 sps:$4 sm:$0xff]  }
  0x90   : > { %1036 = vmatpush1.bf16.msra.mxu0 %v1891_v1  ;;  %v1897_v5 = vld [vmem:[#allocation5 + $0x120] ss:$8 sps:$4 sm:$0xff]   ;;  %v1898_v6 = vld [vmem:[#allocation5 + $0x134] ss:$8 sps:$4 sm:$0xff]   ;;  %v1900_v7 = vld [vmem:[#allocation5 + $0x130] ss:$8 sps:$4 sm:$0xff]  }
  0x91   : > { %1037 = vmatprep.subr.bf16.mxu0 %v1892_v2  ;;  %v1901_v8 = vld [vmem:[#allocation5 + $0x144] ss:$8 sps:$4 sm:$0xff]   ;;  %v1903_v9 = vld [vmem:[#allocation5 + $0x140] ss:$8 sps:$4 sm:$0xff]   ;;  %v1904_v10 = vld [vmem:[#allocation5 + $0x154] ss:$8 sps:$4 sm:$0xff]  }
  0x92   : > { %v1906_v11 = vld [vmem:[#allocation5 + $0x150] ss:$8 sps:$4 sm:$0xff]   ;;  %v1907_v12 = vld [vmem:[#allocation5 + $0x164] ss:$8 sps:$4 sm:$0xff]   ;;  %v1909_v14 = vld [vmem:[#allocation5 + $0x160] ss:$8 sps:$4 sm:$0xff]  }
  0x93   : > { %v1939_v13 = vld [vmem:[%s2510_s22 + $0xc] ss:$28 sps:$4 sm:$0xff]   ;;  %v1946_v16 = vld [vmem:[#allocation5 + $0x4] ss:$8 sps:$4 sm:$0xff]   ;;  %v1951_v19 = vld [vmem:[#allocation5] ss:$8 sps:$4 sm:$0xff]  }
  0x94   : > { %1038 = vmatpush1.bf16.msra.mxu0 %v1894_v3  ;;  %v1910_v15 = vld [vmem:[#allocation5 + $0x174] ss:$8 sps:$4 sm:$0xff]   ;;  %1067 = vmatprep.mubr.bf16.mxu0 %v1939_v13  ;;  %v1912_v17 = vld [vmem:[#allocation5 + $0x170] ss:$8 sps:$4 sm:$0xff]   ;;  %v1913_v18 = vld [vmem:[#allocation5 + $0x184] ss:$8 sps:$4 sm:$0xff]  }
  0x95   : > { %1039 = vmatprep.subr.bf16.mxu0 %v1895_v4  ;;  %992 = vmatprep.subr.bf16.mxu1 %v1946_v16  ;;  %v1952_v20 = vld [vmem:[#allocation5 + $0x14] ss:$8 sps:$4 sm:$0xff]   ;;  %v1915_v21 = vld [vmem:[#allocation5 + $0x180] ss:$8 sps:$4 sm:$0xff]   ;;  %v1957_v22 = vld [vmem:[#allocation5 + $0x10] ss:$8 sps:$4 sm:$0xff]  }
  0x96   : > { %993 = vmatpush1.bf16.msra.mxu1 %v1951_v19  ;;  %v1958_v23 = vld [vmem:[#allocation5 + $0x24] ss:$8 sps:$4 sm:$0xff]   ;;  %v1916_v24 = vld [vmem:[#allocation5 + $0x194] ss:$8 sps:$4 sm:$0xff]   ;;  %v1963_v25 = vld [vmem:[#allocation5 + $0x20] ss:$8 sps:$4 sm:$0xff]  }
  0x97   : > { %994 = vmatprep.subr.bf16.mxu1 %v1952_v20  ;;  %v1964_v26 = vld [vmem:[#allocation5 + $0x34] ss:$8 sps:$4 sm:$0xff]   ;;  %v1918_v27 = vld [vmem:[#allocation5 + $0x190] ss:$8 sps:$4 sm:$0xff]   ;;  %v1919_v28 = vld [vmem:[#allocation5 + $0x1a4] ss:$8 sps:$4 sm:$0xff]  }
  0x98   : > { %1040 = vmatpush1.bf16.msra.mxu0 %v1897_v5  ;;  %v1969_v29 = vld [vmem:[#allocation5 + $0x30] ss:$8 sps:$4 sm:$0xff]   ;;  %v1970_v30 = vld [vmem:[#allocation5 + $0x44] ss:$8 sps:$4 sm:$0xff]   ;;  %v1921_v31 = vld [vmem:[#allocation5 + $0x1a0] ss:$8 sps:$4 sm:$0xff]  }
  0x99   : > { %1041 = vmatprep.subr.bf16.mxu0 %v1898_v6  ;;  %v1922_v32 = vld [vmem:[#allocation5 + $0x1b4] ss:$8 sps:$4 sm:$0xff]   ;;  %v1975_v33 = vld [vmem:[#allocation5 + $0x40] ss:$8 sps:$4 sm:$0xff]   ;;  %v1924_v35 = vld [vmem:[#allocation5 + $0x1b0] ss:$8 sps:$4 sm:$0xff]  }
  0x9a   : > { %995 = vmatpush1.bf16.msra.mxu1 %v1957_v22  ;;  %v1976_v34 = vld [vmem:[#allocation5 + $0x54] ss:$8 sps:$4 sm:$0xff]   ;;  %v1925_v36 = vld [vmem:[#allocation5 + $0x1c4] ss:$8 sps:$4 sm:$0xff]   ;;  %v1981_v37 = vld [vmem:[#allocation5 + $0x50] ss:$8 sps:$4 sm:$0xff]  }
  0x9b   : > { %996 = vmatprep.subr.bf16.mxu1 %v1958_v23  ;;  %v1982_v38 = vld [vmem:[#allocation5 + $0x64] ss:$8 sps:$4 sm:$0xff]   ;;  %v1927_v39 = vld [vmem:[#allocation5 + $0x1c0] ss:$8 sps:$4 sm:$0xff]   ;;  %v1928_v40 = vld [vmem:[#allocation5 + $0x1d4] ss:$8 sps:$4 sm:$0xff]  }
  0x9c   : > { %1042 = vmatpush1.bf16.msra.mxu0 %v1900_v7  ;;  %v1987_v41 = vld [vmem:[#allocation5 + $0x60] ss:$8 sps:$4 sm:$0xff]   ;;  %v1988_v42 = vld [vmem:[#allocation5 + $0x74] ss:$8 sps:$4 sm:$0xff]   ;;  %v1930_v43 = vld [vmem:[#allocation5 + $0x1d0] ss:$8 sps:$4 sm:$0xff]  }
  0x9d   : > { %1043 = vmatprep.subr.bf16.mxu0 %v1901_v8  ;;  %v1931_v44 = vld [vmem:[#allocation5 + $0x1e4] ss:$8 sps:$4 sm:$0xff]   ;;  %v1993_v45 = vld [vmem:[#allocation5 + $0x70] ss:$8 sps:$4 sm:$0xff]   ;;  %v1933_v47 = vld [vmem:[#allocation5 + $0x1e0] ss:$8 sps:$4 sm:$0xff]  }
  0x9e   : > { %997 = vmatpush1.bf16.msra.mxu1 %v1963_v25  ;;  %v1994_v46 = vld [vmem:[#allocation5 + $0x84] ss:$8 sps:$4 sm:$0xff]   ;;  %v1934_v48 = vld [vmem:[#allocation5 + $0x1f4] ss:$8 sps:$4 sm:$0xff]   ;;  %v1999_v49 = vld [vmem:[#allocation5 + $0x80] ss:$8 sps:$4 sm:$0xff]  }
  0x9f   : > { %998 = vmatprep.subr.bf16.mxu1 %v1964_v26  ;;  %v2000_v50 = vld [vmem:[#allocation5 + $0x94] ss:$8 sps:$4 sm:$0xff]   ;;  %v1936_v51 = vld [vmem:[#allocation5 + $0x1f0] ss:$8 sps:$4 sm:$0xff]   ;;  %v1942_v52 = vld [vmem:[#allocation5 + $0x204] ss:$8 sps:$4 sm:$0xff]  }
  0xa0   : > { %1044 = vmatpush1.bf16.msra.mxu0 %v1903_v9  ;;  %v2005_v53 = vld [vmem:[#allocation5 + $0x90] ss:$8 sps:$4 sm:$0xff]   ;;  %v2006_v55 = vld [vmem:[#allocation5 + $0xa4] ss:$8 sps:$4 sm:$0xff]   ;;  %v1940_v56 = vld [vmem:[#allocation5 + $0x200] ss:$8 sps:$4 sm:$0xff]  }
  0xa1   : > { %1045 = vmatprep.subr.bf16.mxu0 %v1904_v10  ;;  %v1937_v54 = vld [vmem:[%s2510_s22 + $0x8] ss:$28 sps:$4 sm:$0xff]   ;;  %v2032_v57 = vld [vmem:[%s2510_s22 + $0x14] ss:$28 sps:$4 sm:$0xff]   ;;  %v2042_v20 = vld [vmem:[%s2510_s22] ss:$28 sps:$4 sm:$0xff]  }
  0xa2   : > { %999 = vmatpush1.bf16.msra.mxu1 %v1969_v29  ;;  %v1945_v58 = vld [vmem:[#allocation5 + $0x214] ss:$8 sps:$4 sm:$0xff]   ;;  %v2011_v59 = vld [vmem:[#allocation5 + $0xa0] ss:$8 sps:$4 sm:$0xff]   ;;  %v1943_v61 = vld [vmem:[#allocation5 + $0x210] ss:$8 sps:$4 sm:$0xff]  }
  0xa3   : > { %1000 = vmatprep.subr.bf16.mxu1 %v1970_v30  ;;  %v2012_v60 = vld [vmem:[#allocation5 + $0xb4] ss:$8 sps:$4 sm:$0xff]   ;;  %v1950_v62 = vld [vmem:[#allocation5 + $0x224] ss:$8 sps:$4 sm:$0xff]   ;;  %v2017_v63 = vld [vmem:[#allocation5 + $0xb0] ss:$8 sps:$4 sm:$0xff]  }
  0xa4   : > { %1046 = vmatpush1.bf16.msra.mxu0 %v1906_v11  ;;  %v2044_v0 = vld [vmem:[%s2510_s22 + $0x4] ss:$28 sps:$4 sm:$0xff]   ;;  %v2048_v22 = vld [vmem:[#allocation7 + $0x48] sm:$0xff]   ;;  %v2050_v26 = vld [vmem:[#allocation7 + $0x50] sm:$0xff]   ;;  %vm988_vm0 = vcmask 130048   ;;  %vm2272_vm1 = vmmov 0  }
  0xa5   : > { %1047 = vmatprep.subr.bf16.mxu0 %v1907_v12  ;;  %v2018_v1 = vld [vmem:[#allocation5 + $0xc4] ss:$8 sps:$4 sm:$0xff]   ;;  %v1948_v2 = vld [vmem:[#allocation5 + $0x220] ss:$8 sps:$4 sm:$0xff]   ;;  %1024 = vmatprep.mubr.bf16.mxu1 %v2044_v0  ;;  %v1956_v3 = vld [vmem:[#allocation5 + $0x234] ss:$8 sps:$4 sm:$0xff]  }
  0xa6   : > { %1001 = vmatpush1.bf16.msra.mxu1 %v1975_v33  ;;  %v2023_v4 = vld [vmem:[#allocation5 + $0xc0] ss:$8 sps:$4 sm:$0xff]   ;;  %v2024_v5 = vld [vmem:[#allocation5 + $0xd4] ss:$8 sps:$4 sm:$0xff]   ;;  %v1954_v6 = vld [vmem:[#allocation5 + $0x230] ss:$8 sps:$4 sm:$0xff]  }
  0xa7   : > { %1002 = vmatprep.subr.bf16.mxu1 %v1976_v34  ;;  %v1962_v7 = vld [vmem:[#allocation5 + $0x244] ss:$8 sps:$4 sm:$0xff]   ;;  %v1960_v8 = vld [vmem:[#allocation5 + $0x240] ss:$8 sps:$4 sm:$0xff]   ;;  %v2029_v9 = vld [vmem:[#allocation5 + $0xd0] ss:$8 sps:$4 sm:$0xff]  }
  0xa8   : > { %1048 = vmatpush1.bf16.msra.mxu0 %v1909_v14  ;;  %v2033_v10 = vld [vmem:[#allocation5 + $0xe4] ss:$8 sps:$4 sm:$0xff]   ;;  %v1968_v11 = vld [vmem:[#allocation5 + $0x254] ss:$8 sps:$4 sm:$0xff]   ;;  %v2038_v12 = vld [vmem:[#allocation5 + $0xe0] ss:$8 sps:$4 sm:$0xff]  }
  0xa9   : > { %1049 = vmatprep.subr.bf16.mxu0 %v1910_v15  ;;  %v2039_v13 = vld [vmem:[#allocation5 + $0xf4] ss:$8 sps:$4 sm:$0xff]   ;;  %v1966_v14 = vld [vmem:[#allocation5 + $0x250] ss:$8 sps:$4 sm:$0xff]   ;;  %v1974_v15 = vld [vmem:[#allocation5 + $0x264] ss:$8 sps:$4 sm:$0xff]  }
  0xaa   : > { %1003 = vmatpush1.bf16.msra.mxu1 %v1981_v37  ;;  %v2041_v16 = vld [vmem:[#allocation5 + $0xf0] ss:$8 sps:$4 sm:$0xff]   ;;  %v1980_v19 = vld [vmem:[#allocation5 + $0x274] ss:$8 sps:$4 sm:$0xff]   ;;  %v2051_v29 = vld [vmem:[#allocation7 + $0x10] sm:$0xff]   ;;  %s1592_s11 = sshll.u32 %s2506_s1, 4 }
  0xab   : > { %1004 = vmatprep.subr.bf16.mxu1 %v1982_v38  ;;  %v1978_v23 = vld [vmem:[#allocation5 + $0x270] ss:$8 sps:$4 sm:$0xff]   ;;  %v2052_v30 = vld [vmem:[#allocation7 + $0x58] sm:$0xff]   ;;  %s341_s21 = scalar_lea.vmem [#allocation10], %s1592_s11  ;;  %s1730_s17 = sshll.u32 %s2337_s28, 8 }
  0xac   : > { %1050 = vmatpush1.bf16.msra.mxu0 %v1912_v17  ;;  %v2046_v17 = vld [vmem:[#allocation7 + $0x40] sm:$0xff]   ;;  %v2049_v25 = vld [vmem:[#allocation7 + $0x8] sm:$0xff]   ;;  %v2053_v33 = vld [vmem:[#allocation7 + $0x18] sm:$0xff]   ;;  %s1477_s23 = sshll.u32 %s341_s21, 4  ;;  %s2547_s8 = scalar_lea.hbm %s2598_s7, %s1730_s17  ;;  %s2542_s23 = int_to_ptr.vmem [resolvable:$true] %s1477_s23 }
  0xad   : > { %1051 = vmatprep.subr.bf16.mxu0 %v1913_v18  ;;  %v1972_v18 = vld [vmem:[#allocation5 + $0x260] ss:$8 sps:$4 sm:$0xff]   ;;  %v2054_v34 = vld [vmem:[#allocation7 + $0x60] sm:$0xff]   ;;  %v2010_v38 = vld [vmem:[#allocation5 + $0x2c4] ss:$8 sps:$4 sm:$0xff]   ;;  %s1464_s19 = scalar_lea.sflag [#allocation4], %s2506_s1 }
  0xae   : > { %1005 = vmatpush1.bf16.msra.mxu1 %v1987_v41  ;;  %v2002_v37 = vld [vmem:[#allocation5 + $0x2b0] ss:$8 sps:$4 sm:$0xff]   ;;  %s2184_s28 = scalar_lea.vmem %s2542_s23, 256 }
  0xaf   : > { %1006 = vmatprep.subr.bf16.mxu1 %v1988_v42  ;;  %v2014_v41 = vld [vmem:[#allocation5 + $0x2d0] ss:$8 sps:$4 sm:$0xff]   ;;  %v2022_v42 = vld [vmem:[#allocation5 + $0x2e4] ss:$8 sps:$4 sm:$0xff]   ;;  %p2185_p10 = scmp.ne.s32.totalorder %s2542_s23, %s2184_s28 }
  0xb0   : > { %1052 = vmatpush1.bf16.msra.mxu0 %v1915_v21  ;;  %v2047_v21 = vld [vmem:[#allocation7] sm:$0xff]  }
  0xb1   : > { %1053 = vmatprep.subr.bf16.mxu0 %v1916_v24  ;;  %v1986_v24 = vld [vmem:[#allocation5 + $0x284] ss:$8 sps:$4 sm:$0xff]   ;;  %p2186_p3 = pnand %p2185_p10, %p2458_p5 }
  0xb2   : > { %1007 = vmatpush1.bf16.msra.mxu1 %v1993_v45  ;;  %v2026_v45 = vld [vmem:[#allocation5 + $0x2f0] ss:$8 sps:$4 sm:$0xff]  }
  0xb3   : > { %1008 = vmatprep.subr.bf16.mxu1 %v1994_v46  ;;  %v2037_v46 = vld [vmem:[#allocation5 + $0x304] ss:$8 sps:$4 sm:$0xff]   ;;  %p2187_p7 = pneg %p2186_p3 }
  0xb4   : > { %1054 = vmatpush1.bf16.msra.mxu0 %v1918_v27  ;;  %v1984_v27 = vld [vmem:[#allocation5 + $0x280] ss:$8 sps:$4 sm:$0xff]  }
  0xb5   : > { %1055 = vmatprep.subr.bf16.mxu0 %v1919_v28  ;;  %v1992_v28 = vld [vmem:[#allocation5 + $0x294] ss:$8 sps:$4 sm:$0xff]  }
  0xb6   : > { %1009 = vmatpush1.bf16.msra.mxu1 %v1999_v49  ;;  %v2270_v49 = vmov 0  }
  0xb7   : > { %1010 = vmatprep.subr.bf16.mxu1 %v2000_v50  ;;  %v2045_v50 = vld [vmem:[%s2510_s22 + $0x18] ss:$28 sps:$4 sm:$0xff]  }
  0xb8   : > { %1056 = vmatpush1.bf16.msra.mxu0 %v1921_v31  ;;  %v1990_v31 = vld [vmem:[#allocation5 + $0x290] ss:$8 sps:$4 sm:$0xff]  }
  0xb9   : > { %1057 = vmatprep.subr.bf16.mxu0 %v1922_v32  ;;  %v1998_v32 = vld [vmem:[#allocation5 + $0x2a4] ss:$8 sps:$4 sm:$0xff]  }
  0xba   : > { %1011 = vmatpush1.bf16.msra.mxu1 %v2005_v53  ;;  %v2057_v53 = vld [vmem:[#allocation7 + $0x28] sm:$0xff]  }
  0xbb   : > { %1012 = vmatprep.subr.bf16.mxu1 %v2006_v55  ;;  %v2059_v55 = vld [vmem:[#allocation7 + $0x30] sm:$0xff]  }
  0xbc   : > { %1058 = vmatpush1.bf16.msra.mxu0 %v1924_v35  ;;  %v1996_v35 = vld [vmem:[#allocation5 + $0x2a0] ss:$8 sps:$4 sm:$0xff]  }
  0xbd   : > { %1059 = vmatprep.subr.bf16.mxu0 %v1925_v36  ;;  %v2004_v36 = vld [vmem:[#allocation5 + $0x2b4] ss:$8 sps:$4 sm:$0xff]  }
  0xbe   : > { %1013 = vmatpush1.bf16.msra.mxu1 %v2011_v59 }
  0xbf   : > { %1014 = vmatprep.subr.bf16.mxu1 %v2012_v60 }
  0xc0   : > { %1060 = vmatpush1.bf16.msra.mxu0 %v1927_v39  ;;  %v2008_v39 = vld [vmem:[#allocation5 + $0x2c0] ss:$8 sps:$4 sm:$0xff]  }
  0xc1   : > { %1061 = vmatprep.subr.bf16.mxu0 %v1928_v40  ;;  %v2016_v40 = vld [vmem:[#allocation5 + $0x2d4] ss:$8 sps:$4 sm:$0xff]  }
  0xc2   : > { %1015 = vmatpush1.bf16.msra.mxu1 %v2017_v63  ;;  %v453_v63 = vlaneseq }
  0xc3   : > { %1016 = vmatprep.subr.bf16.mxu1 %v2018_v1 }
  0xc4   : > { %1062 = vmatpush1.bf16.msra.mxu0 %v1930_v43  ;;  %v2020_v43 = vld [vmem:[#allocation5 + $0x2e0] ss:$8 sps:$4 sm:$0xff]   ;;  %v454_v0 = vshrl.u32 %v453_v63, 7 }
  0xc5   : > { %1063 = vmatprep.subr.bf16.mxu0 %v1931_v44  ;;  %v2028_v44 = vld [vmem:[#allocation5 + $0x2f4] ss:$8 sps:$4 sm:$0xff]  }
  0xc6   : > { %1017 = vmatpush1.bf16.msra.mxu1 %v2023_v4  ;;  %v455_v1 = vsub.s32 0, %v454_v0 }
  0xc7   : > { %1018 = vmatprep.subr.bf16.mxu1 %v2024_v5 }
  0xc8   : > { %1064 = vmatpush1.bf16.msra.mxu0 %v1933_v47  ;;  %v2030_v47 = vld [vmem:[%s2510_s22 + $0x10] ss:$28 sps:$4 sm:$0xff]   ;;  %s2273_s22 = smov [#allocation10]  }
  0xc9   : > { %1065 = vmatprep.subr.bf16.mxu0 %v1934_v48  ;;  %v2035_v48 = vld [vmem:[#allocation5 + $0x300] ss:$8 sps:$4 sm:$0xff]   ;;  %s2188_s30 = sshll.u32 %s2273_s22, 4  ;;  %s2189_s30 = int_to_ptr.vmem [resolvable:$false] %s2188_s30 }
  0xca   : > { %1019 = vmatpush1.bf16.msra.mxu1 %v2029_v9  ;;  %s2190_s9 = scalar_lea.vmem %s2189_s30, 512  ;;  %p2191_p12 = scmp.lt.s32.totalorder %s2542_s23, %s2189_s30 }
  0xcb   : > { %1020 = vmatprep.subr.bf16.mxu1 %v2033_v10  ;;  %p2192_p2 = scmp.lt.s32.totalorder %s2190_s9, %s2184_s28 }
  0xcc   : > { %1066 = vmatpush1.bf16.msra.mxu0 %v1936_v51  ;;  %v2055_v51 = vld [vmem:[#allocation7 + $0x20] sm:$0xff]  }
  0xcd   : > { %1078 = vmatprep.subr.bf16.mxu0 %v1942_v52  ;;  %v2056_v52 = vld [vmem:[#allocation7 + $0x68] sm:$0xff]   ;;  %p2193_p1 = por %p2192_p2, %p2191_p12 }
  0xce   : > { %1021 = vmatpush1.bf16.msra.mxu1 %v2038_v12 }
  0xcf   : > { %1068 = vmatmul.mubr.bf16.vlgmr.msra.gmra.mrb[0].mxu0 %v1937_v54  ;;  %1022 = vmatprep.subr.bf16.mxu1 %v2039_v13  ;;  %v2058_v54 = vld [vmem:[#allocation7 + $0x70] sm:$0xff]   ;;  %p2194_p4 = pnand %p2193_p1, %p2187_p7 }
  0xd0   : > { %1079 = vmatpush1.bf16.msra.mxu0 %v1940_v56  ;;  %1110 = vmatprep.mubr.bf16.mxu0 %v2032_v57  ;;  %v2060_v56 = vld [vmem:[#allocation7 + $0x78] sm:$0xff]  }
  0xd1   : > { %1080 = vmatprep.subr.bf16.mxu0 %v1945_v58  ;;  %v2061_v57 = vld [vmem:[#allocation7 + $0x38] sm:$0xff]   ;;  %v2271_v58 = vmov 0.0  }
  0xd2   : > { %1023 = vmatpush1.bf16.msra.mxu1 %v2041_v16 }
  0xd3   : > { %1731 = vmatprep.subr.bf16.mxu1 %v2046_v17 }
  0xd4   : > { %1081 = vmatpush1.bf16.msra.mxu0 %v1943_v61 }
  0xd5   : > { %1082 = vmatprep.subr.bf16.mxu0 %v1950_v62  ;;  %1025 = vmatmul.mubr.bf16.vlgmr.msra.gmra.mrb[0].mxu1 %v2042_v20 }
  0xd6   : > { %1732 = vmatpush3.bf16.msra.mxu1 %v2047_v21 }
  0xd7   : > { %1733 = vmatprep.subr.bf16.mxu1 %v2048_v22 }
  0xd8   : > { %1083 = vmatpush1.bf16.msra.mxu0 %v1948_v2  ;;  %v451_v2 = vld [vmem:[%s2593_s2] sm:$0x3] }
  0xd9   : > { %1084 = vmatprep.subr.bf16.mxu0 %v1956_v3  ;;  %v459_v3 = vsub.s32 1, %v454_v0  ;;  %v456_v4 = vrot.slane %v451_v2, %v455_v1 }
  0xda   : > { %1734 = vmatpush3.bf16.msra.mxu1 %v2049_v25  ;;  %v2063_v25 = vld [vmem:[#allocation8 + $0x8] sm:$0xff]  }
  0xdb   : > { %1735 = vmatprep.subr.bf16.mxu1 %v2050_v26  ;;  %v460_v5 = vrot.slane %v451_v2, %v459_v3  ;;  %v2064_v26 = vld [vmem:[#allocation8 + $0x10] sm:$0xff]  }
  0xdc   : > { %1085 = vmatpush1.bf16.msra.mxu0 %v1954_v6 }
  0xdd   : > { %1086 = vmatprep.subr.bf16.mxu0 %v1962_v7 }
  0xde   : > { %1736 = vmatpush3.bf16.msra.mxu1 %v2051_v29  ;;  %v2067_v29 = vld [vmem:[#allocation8 + $0x28] sm:$0xff]  }
  0xdf   : > { %1737 = vmatprep.subr.bf16.mxu1 %v2052_v30  ;;  %v2068_v30 = vld [vmem:[#allocation8 + $0x30] sm:$0xff]  }
  0xe0   : > { %1087 = vmatpush1.bf16.msra.mxu0 %v1960_v8 }
  0xe1   : > { %1088 = vmatprep.subr.bf16.mxu0 %v1968_v11 }
  0xe2   : > { %1738 = vmatpush3.bf16.msra.mxu1 %v2053_v33  ;;  %v1699_v33 = vld [vmem:[%s2595_s4] ss:$0 sm:$0xff] }
  0xe3   : > { %1739 = vmatprep.subr.bf16.mxu1 %v2054_v34 }
  0xe4   : > { %1089 = vmatpush1.bf16.msra.mxu0 %v1966_v14 }
  0xe5   : > { %1090 = vmatprep.subr.bf16.mxu0 %v1974_v15 }
  0xe6   : > { %1740 = vmatpush3.bf16.msra.mxu1 %v2055_v51 }
  0xe7   : > { %1741 = vmatprep.subr.bf16.mxu1 %v2056_v52 }
  0xe8   : > { %1091 = vmatpush1.bf16.msra.mxu0 %v1972_v18 }
  0xe9   : > { %1092 = vmatprep.subr.bf16.mxu0 %v1980_v19 }
  0xea   : > { %1742 = vmatpush3.bf16.msra.mxu1 %v2057_v53 }
  0xeb   : > { %1743 = vmatprep.subr.bf16.mxu1 %v2058_v54 }
  0xec   : > { %1093 = vmatpush1.bf16.msra.mxu0 %v1978_v23 }
  0xed   : > { %1094 = vmatprep.subr.bf16.mxu0 %v1986_v24  ;;  %v2062_v24 = vld [vmem:[#allocation8] sm:$0xff]  }
  0xee   : > { %1744 = vmatpush3.bf16.msra.mxu1 %v2059_v55 }
  0xef   : > { %1745 = vmatprep.subr.bf16.mxu1 %v2060_v56 }
  0xf0   : > { %1095 = vmatpush1.bf16.msra.mxu0 %v1984_v27  ;;  %v2065_v27 = vld [vmem:[#allocation8 + $0x18] sm:$0xff]  }
  0xf1   : > { %1096 = vmatprep.subr.bf16.mxu0 %v1992_v28  ;;  %v2066_v28 = vld [vmem:[#allocation8 + $0x20] sm:$0xff]  }
  0xf2   : > { %1746 = vmatpush3.bf16.msra.mxu1 %v2061_v57 }
  0xf3   : > { %1762 = vmatprep.subr.bf16.mxu1 %v2271_v58 }
  0xf4   : > { %1097 = vmatpush1.bf16.msra.mxu0 %v1990_v31  ;;  %v2069_v31 = vld [vmem:[#allocation8 + $0x38] sm:$0xff]  }
  0xf5   : > { %1098 = vmatprep.subr.bf16.mxu0 %v1998_v32 }
  0xf8   : > { %1099 = vmatpush1.bf16.msra.mxu0 %v1996_v35 }
  0xf9   : > { %1100 = vmatprep.subr.bf16.mxu0 %v2004_v36 }
  0xfc   : > { %1101 = vmatpush1.bf16.msra.mxu0 %v2002_v37 }
  0xfd   : > { %1102 = vmatprep.subr.bf16.mxu0 %v2010_v38 }
 0x100   : > { %1103 = vmatpush1.bf16.msra.mxu0 %v2008_v39 }
 0x101   : > { %1104 = vmatprep.subr.bf16.mxu0 %v2016_v40 }
 0x104   : > { %1105 = vmatpush1.bf16.msra.mxu0 %v2014_v41 }
 0x105   : > { %1106 = vmatprep.subr.bf16.mxu0 %v2022_v42 }
 0x108   : > { %1107 = vmatpush1.bf16.msra.mxu0 %v2020_v43 }
 0x109   : > { %1108 = vmatprep.subr.bf16.mxu0 %v2028_v44  ;;  %v1716_v44 = vld [vmem:[%s2597_s6] ss:$0 sm:$0xff] }
 0x10c   : > { %1109 = vmatpush1.bf16.msra.mxu0 %v2026_v45 }
 0x10d   : > { %1121 = vmatprep.subr.bf16.mxu0 %v2037_v46 }
 0x10f   : > { %1111 = vmatmul.mubr.bf16.vlgmr.msra.gmra.mrb[0].mxu0 %v2030_v47 }
 0x110   : > { %1122 = vmatpush1.bf16.msra.mxu0 %v2035_v48  ;;  %1153 = vmatprep.mubr.bf16.mxu0 %v2270_v49 }
 0x11b   : > { %1698 = vmatmul.mubr.msk.bf16.vlgmr.msra.gmra.mrb[0].mxu0 %vm988_vm0, %v2045_v50 }
 0x1a8   : > { %v1026_v59 = vpop.f32.mrb[0].mxu1 }
 0x1a9   : > { %v1028_v60 = vpop.f32.mrb[1].mxu1  ;;  %v1027_v6 = vadd.f32 %v1026_v59, %v456_v4 }
 0x1aa   : > { %v1030_v61 = vpop.f32.mrb[2].mxu1  ;;  %v1029_v7 = vadd.f32 %v1028_v60, %v460_v5 }
 0x1ab   : > { %v1032_v62 = vpop.f32.mrb[3].mxu1  ;;  %v1031_v9 = vadd.f32 %v1030_v61, %v456_v4 }
 0x1ac   : > { %v1033_v12 = vadd.f32 %v1032_v62, %v460_v5 }
 0x1ee   : > { %v1155_v8 = vpop.f32.mrb[0].mxu0 }
 0x1ef   : > { %v1783_v10 = vadd.f32 %v1155_v8, %v1027_v6  ;;  %v1157_v11 = vpop.f32.mrb[1].mxu0 }
 0x1f0   : > { %v1785_v13 = vadd.f32 %v1157_v11, %v1029_v7  ;;  %v1159_v14 = vpop.f32.mrb[2].mxu0 }
 0x1f1   : > { %v1787_v15 = vadd.f32 %v1159_v14, %v1031_v9  ;;  %v1161_v16 = vpop.f32.mrb[3].mxu0  ;;  %v1164_v18 = vmax.f32 %v1783_v10, 0.0 }
 0x1f2   : > { %v1789_v17 = vadd.f32 %v1161_v16, %v1033_v12  ;;  %v1165_v20 = vmax.f32 %v1785_v13, 0.0 }
 0x1f3   : > { %v1166_v19 = vmax.f32 %v1787_v15, 0.0 }
 0x1f4   : > { %v1167_v21 = vmax.f32 %v1789_v17, 0.0 }
 0x1f5   : > { %v1168_v22 = vpack.c.bf16 %v1166_v19, %v1164_v18 }
 0x1f6   : > { %v1169_v23 = vpack.c.bf16 %v1167_v21, %v1165_v20 }
 0x1f8   : > { %1337 = vmatprep.mubr.bf16.mxu1 %v1169_v23 }
 0x1f9   : > { %1338 = vmatmul.mubr.bf16.vlgmr.msra.gmra.mrb[4].mxu1 %v1168_v22 }
 0x1fa   : > { %1763 = vmatpush3.bf16.msra.mxu1 %v2062_v24  ;;  %1778 = vmatprep.mubr.msk.bf16.mxu1 %vm2272_vm1, %v2271_v58 }
 0x1fb   : > { %1764 = vmatprep.subr.bf16.mxu1 %v2271_v58 }
 0x1fe   : > { %1765 = vmatpush3.bf16.msra.mxu1 %v2063_v25 }
 0x1ff   : > { %1766 = vmatprep.subr.bf16.mxu1 %v2271_v58 }
 0x202   : > { %1767 = vmatpush3.bf16.msra.mxu1 %v2064_v26 }
 0x203   : > { %1768 = vmatprep.subr.bf16.mxu1 %v2271_v58 }
 0x206   : > { %1769 = vmatpush3.bf16.msra.mxu1 %v2065_v27 }
 0x207   : > { %1770 = vmatprep.subr.bf16.mxu1 %v2271_v58 }
 0x20a   : > { %1771 = vmatpush3.bf16.msra.mxu1 %v2066_v28 }
 0x20b   : > { %1772 = vmatprep.subr.bf16.mxu1 %v2271_v58 }
 0x20e   : > { %1773 = vmatpush3.bf16.msra.mxu1 %v2067_v29 }
 0x20f   : > { %1774 = vmatprep.subr.bf16.mxu1 %v2271_v58 }
 0x212   : > { %1775 = vmatpush3.bf16.msra.mxu1 %v2068_v30 }
 0x213   : > { %1776 = vmatprep.subr.bf16.mxu1 %v2271_v58 }
 0x216   : > { %1777 = vmatpush3.bf16.msra.mxu1 %v2069_v31 }
 0x2cc   : > { %v1747_v32 = vpop.f32.mrb[4].mxu1 }
 0x2cd   : > { %v1748_v34 = vpop.f32.mrb[5].mxu1 }
 0x2ce   : > { %v1749_v35 = vadd.f32 %v1748_v34, %v1747_v32  ;;  %v1750_v36 = vpop.f32.mrb[6].mxu1 }
 0x2cf   : > { %v1751_v37 = vpop.f32.mrb[7].mxu1 }
 0x2d0   : > { %v1340_v38 = vadd.f32 %v1749_v35, %v1699_v33  ;;  %v1752_v39 = vadd.f32 %v1751_v37, %v1750_v36 }
 0x2d2   : > { %v1343_v40 = vadd.f32 %v1752_v39, %v1699_v33  ;;  %v1346_v41 = vmax.f32 %v1340_v38, 0.0 }
 0x2d4   : > { %v1347_v42 = vmax.f32 %v1343_v40, 0.0 }
 0x2d6   : > { %v1348_v43 = vpack.c.bf16 %v1347_v42, %v1346_v41 }
 0x2d8   : > { %1779 = vmatmul.mubr.bf16.vlgmr.msra.gmra.mrb[8].mxu1 %v1348_v43 }
 0x3ab   : > { %v1454_v45 = vpop.f32.mrb[8].mxu1 }
 0x3ac   : > { %v1455_v46 = vadd.f32 %v1716_v44, %v1454_v45  ;;  %v1780_v47 = vpop.f32.mrb[9].mxu1 }
 0x3ad   : > { %v1457_v48 = vpop.f32.mrb[10].mxu1 }
 0x3ae   : > { %1461 = vst [vmem:[%s341_s21] sm:$0xff] %v1455_v46  ;;  %v1458_v49 = vadd.f32 %v1716_v44, %v1457_v48  ;;  %v1781_v50 = vpop.f32.mrb[11].mxu1 }
 0x3b0   : > { %1462 = vst [vmem:[%s341_s21 + $0x8] sm:$0xff] %v1458_v49 }
 0x3b1   : > { %2197 = shalt.err (!%p2194_p4)
}
 0x3b2   : > { %s2198_s29 = scalar_lea.hbm %s2547_s8, 256  ;;  %s2202_s14 = scalar_lea.hbm %s2598_s7, 512 }
 0x3b3   : > { %p2199_p9 = scmp.ne.s32.totalorder %s2547_s8, %s2198_s29  ;;  %p2203_p8 = scmp.lt.u32.totalorder %s2547_s8, %s2598_s7 }
 0x3b4   : > { %p2204_p13 = scmp.lt.u32.totalorder %s2202_s14, %s2198_s29  ;;  %p2206_p10 = scmp.lt.u32.totalorder %s2198_s29, %s2547_s8 }
 0x3b5   : > { %p2200_p0 = pnand %p2199_p9, %p2458_p5 }
 0x3b6   : > { %p2205_p6 = por %p2204_p13, %p2203_p8 }
 0x3b7   : > { %p2201_p11 = pneg %p2200_p0 }
 0x3b8   : > { %p2207_p3 = por %p2206_p10, %p2205_p6 }
 0x3ba   : > { %p2208_p7 = pnand %p2207_p3, %p2201_p11 }
 0x3bc   : > { %2211 = shalt.err (!%p2208_p7)
}
 0x3bd   : > { %s2274_s17 = smov 128   ;;  %s2275_s13 = smov 8  }
 0x3be   : > { %1815 = dma.vmem_to_hbm [thread:$0]  (%p2458_p5), %s2542_s23, 256, %s2547_s8, %s1464_s19, %s2274_s17, %s2274_s17, %s2275_s13  }
 0x3bf PF: > { %s2620_s15 = sld [smem:[#allocation15_spill]]  ;;  %s1492_s28 = sand.u32 1, %s2246_s24  }
 0x3c0   : > { %p2622_p2 = scmp.ge.s32.totalorder %s2258_s27, 2  ;;  %s1493_s22 = scalar_lea.sflag [#allocation4], %s1492_s28 }
 0x3c5   : > { %p2621_p12 = scmp.ne.s32.totalorder %s2620_s15, 0 }
 0x3c7   : > { %p1832_p1 = pnand %p2622_p2, %p2621_p12 }
 0x3c9   : > { %2241 = dma.done.wait (!%p1832_p1), %s1493_s22, 256  }
 0x3ca   : > { %2243 = vsyncadd (!%p1832_p1), %s1493_s22, 4294967040  ;;  %p22_p4 = scmp.ge.s32.totalorder %s2426_s18, 4   ;;  %s2623_s24 = smov %s2250_s25 }
 0x3cb   : > { %s2624_s25 = smov %s2254_s26  ;;  %s2625_s26 = smov %s2454_s12 }
 0x3cc   : > { %s2626_s27 = smov %s2426_s18  ;;  %24 = sbr.rel (!%p22_p4) target bundleno = 9 (0x9), region = 105 }
 0x3d3   :  { %1498 = vsyncpa [#allocation3], 1 }
 0x3d4   :  { %1500 = vsyncpa [#allocation3 + $0x1], 1 }
 0x3d5   :  { %1501 = vsyncpa [#allocation6], 1 }
 0x3d6   :  { %1502 = vsyncpa [#allocation9], 1 }
 0x3d7   :  { %1503 = vsyncpa [#allocation4], 1 }
 0x3d8   :  { %1505 = vsyncpa [#allocation4 + $0x1], 1 }

</bundles_post_ra>
